<compile_context>
chip_gen: v6e
topology: v6e:2x2x1
jax: 0.10.0
libtpu: 0.0.40
codegen_flags: <defaults>
</compile_context>

<pallas_src>
import jax
import jax.numpy as jnp
from jax import lax
from jax.experimental import pallas as pl
from jax.experimental.pallas import tpu as pltpu


def _round_up(x: int, m: int) -> int:
    return (x + m - 1) // m * m


def _cdiv(a: int, b: int) -> int:
    return (a + b - 1) // b


# ------------------------------ kernels -------------------------------------


def _linear_kernel_noacc(x_ref, w_ref, o_ref):
    """Single-K-step variant: whole contraction in one tile pair, direct write."""
    o_ref[...] = lax.dot_general(
        x_ref[...],
        w_ref[...],
        dimension_numbers=(((1,), (1,)), ((), ())),
        preferred_element_type=jnp.float32,
    ).astype(o_ref.dtype)


def _linear_kernel_acc(x_ref, w_ref, o_ref, acc_ref):
    """Multi-K-step variant with a resident f32 accumulator.

    x_ref:   (tm, tk) tile of the flattened input
    w_ref:   (tn, tk) tile of the weight (embedding_dims x num_indices)
    o_ref:   (tm, tn) output tile
    acc_ref: (tm, tn) f32 accumulator scratch (resident across K iterations)
    """
    @pl.when(pl.program_id(2) == 0)
    def _():
        acc_ref[...] = jnp.zeros_like(acc_ref)

    # out_tile += x_tile @ w_tile.T as a contraction over the last dim of BOTH
    # operands -> pure MXU push (MRB in-place accumulate on v7x), no transpose.
    acc_ref[...] += lax.dot_general(
        x_ref[...],
        w_ref[...],
        dimension_numbers=(((1,), (1,)), ((), ())),
        preferred_element_type=jnp.float32,
    )

    @pl.when(pl.program_id(2) == pl.num_programs(2) - 1)
    def _():
        o_ref[...] = acc_ref[...].astype(o_ref.dtype)


# ----------------------- generation-aware tile sizing -----------------------


def _vmem_limits():
    """(tile-footprint budget, Mosaic scoped-VMEM limit) in bytes."""
    try:
        phys = int(pltpu.get_tpu_info().vmem_capacity_bytes)
    except Exception:
        phys = 64 * 1024 * 1024  # conservative fallback = v7x per-core VMEM
    budget = max(16 << 20, int(phys * 0.70))
    limit = max(32 << 20, int(phys * 0.90))
    return budget, limit


def _footprint_bytes(tm, tn, tk, k_steps, x_b, w_b, o_b):
    """Double-buffered x + W + out tiles, plus the f32 accumulator if needed."""
    acc = tm * tn * 4 if k_steps > 1 else 0
    return 2 * tm * tk * x_b + 2 * tn * tk * w_b + 2 * tm * tn * o_b + acc


def _divisor_candidates(total, align, cap, max_candidates=16):
    """Multiples of `align` that exactly divide `total`, descending, <= cap."""
    cap = min(cap, total)
    t = (cap // align) * align
    out = []
    while t >= align and len(out) < max_candidates:
        if total % t == 0:
            out.append(t)
        t -= align
    return out or [align]


def _tm_candidates(m_aligned, sub):
    cands = []
    for v in (4096, 2048, 1024, 512, 256, 128, 64, 32, 16, 8):
        t = min(m_aligned, _round_up(v, sub))
        if t >= sub and t not in cands:
            cands.append(t)
    return cands


def _choose_tiles(m, n_al, k_al, x_b, w_b, o_b, sub_m, budget):
    """Pick (tm, tn, tk) minimizing HBM traffic under the VMEM budget.

    tn / tk are 128-multiples that exactly divide the aligned N / K, so the
    weight never needs padding on the fast path.  tm only needs sublane
    alignment (x is padded along M, which is cheap).
    """
    m_aligned = _round_up(max(m, 1), sub_m)
    tk_cands = _divisor_candidates(k_al, 128, cap=8192)
    tn_cands = _divisor_candidates(n_al, 128, cap=2048)
    tm_cands = _tm_candidates(m_aligned, sub_m)

    best, best_key = None, None
    for tk in tk_cands:
        k_steps = k_al // tk
        for tm in tm_cands:
            m_tiles = _cdiv(m_aligned, tm)
            for tn in tn_cands:
                n_tiles = n_al // tn
                fp = _footprint_bytes(tm, tn, tk, k_steps, x_b, w_b, o_b)
                if fp > budget:
                    continue
                # Weight streaming dominates HBM traffic; x re-streams per j.
                w_traffic = n_al * k_al * w_b * m_tiles
                x_traffic = m_tiles * tm * k_al * x_b * n_tiles
                steps = m_tiles * n_tiles * k_steps
                key = (w_traffic + x_traffic, steps, -tm, -tn)
                if best_key is None or key < best_key:
                    best, best_key = (tm, tn, tk), key

    if best is None:
        best = (sub_m, 128, 128)  # minimal tiles always fit

    tm, tn, tk = best
    # v7x has 2 TensorCores: guarantee >= 2 parallel (i, j) tiles when the
    # whole output would otherwise fit a single tile.  Splitting j keeps total
    # weight traffic unchanged; no-op cost on v5e/v6e.
    m_aligned = _round_up(max(m, 1), sub_m)
    if _cdiv(m_aligned, tm) * (n_al // tn) == 1 and tn >= 256:
        tn //= 2
    return tm, tn, tk


# --------------------------------- wrapper -----------------------------------


@jax.jit
def embedding_forward(x, weight):
    """out = x @ weight.T with weight of shape (embedding_dims, num_indices)."""
    *batch_dims, num_indices = x.shape
    embedding_dims, k_w = weight.shape
    assert k_w == num_indices, "last dim of x must equal num_indices"

    x2d = x.reshape(-1, num_indices)
    m = x2d.shape[0]

    x_b = x.dtype.itemsize
    w_b = weight.dtype.itemsize
    sub_m = max(8, 32 // x_b)  # sublane minimum: 8 f32 / 16 bf16 / 32 int8

    n_al = _round_up(embedding_dims, 128)
    k_al = _round_up(num_indices, 128)

    w = weight
    if (n_al, k_al) != (embedding_dims, num_indices):
        # TODO(synk): pre-pad the table to 128-aligned (N, K) once at init so
        # this full HBM read+write of W is never paid inside the forward pass.
        w = jnp.pad(weight, ((0, n_al - embedding_dims), (0, k_al - num_indices)))

    budget, vmem_limit = _vmem_limits()
    tm, tn, tk = _choose_tiles(m, n_al, k_al, x_b, w_b, x_b, sub_m, budget)

    m_pad = _round_up(max(m, 1), tm)
    if (m_pad, k_al) != (m, num_indices):
        # Padding x along M/K is cheap (x is the small operand); zeros along K
        # are a mathematical no-op for the contraction.
        x2d = jnp.pad(x2d, ((0, m_pad - m), (0, k_al - num_indices)))

    k_steps = k_al // tk
    grid_ij = (m_pad // tm, n_al // tn)

    if k_steps == 1:
        # Whole contraction in one step: write o_ref directly, no accumulator.
        out2d = pl.pallas_call(
            _linear_kernel_noacc,
            out_shape=jax.ShapeDtypeStruct((m_pad, n_al), x.dtype),
            grid_spec=pltpu.PrefetchScalarGridSpec(
                num_scalar_prefetch=0,
                grid=grid_ij,
                in_specs=[
                    pl.BlockSpec((tm, tk), lambda i, j: (i, 0)),  # x tile
                    pl.BlockSpec((tn, tk), lambda i, j: (j, 0)),  # weight tile
                ],
                out_specs=pl.BlockSpec((tm, tn), lambda i, j: (i, j)),
            ),
            compiler_params=pltpu.CompilerParams(
                dimension_semantics=("parallel", "parallel"),
                vmem_limit_bytes=vmem_limit,
            ),
        )(x2d, w)
    else:
        out2d = pl.pallas_call(
            _linear_kernel_acc,
            out_shape=jax.ShapeDtypeStruct((m_pad, n_al), x.dtype),
            grid_spec=pltpu.PrefetchScalarGridSpec(
                num_scalar_prefetch=0,
                grid=grid_ij + (k_steps,),
                in_specs=[
                    pl.BlockSpec((tm, tk), lambda i, j, k: (i, k)),  # x tile
                    pl.BlockSpec((tn, tk), lambda i, j, k: (j, k)),  # weight tile
                ],
                out_specs=pl.BlockSpec((tm, tn), lambda i, j, k: (i, j)),
                scratch_shapes=[pltpu.VMEM((tm, tn), jnp.float32)],
            ),
            compiler_params=pltpu.CompilerParams(
                dimension_semantics=("parallel", "parallel", "arbitrary"),
                vmem_limit_bytes=vmem_limit,
            ),
        )(x2d, w)

    if (m_pad, n_al) != (m, embedding_dims):
        out2d = out2d[:m, :embedding_dims]
    return out2d.reshape(*batch_dims, embedding_dims)


def init_embedding_weight(key, num_indices, embedding_dims, num_ones, dtype=jnp.float32):
    """Matches nn.init.normal_(weight, mean=0, std=1/num_ones) deterministically."""
    std = 1.0 / float(num_ones)
    return (std * jax.random.normal(key, (embedding_dims, num_indices))).astype(dtype)


if __name__ == "__main__":
    # Small, module-consistent shapes.
    num_indices = 256     # input feature dim (K)
    embedding_dims = 128  # output feature dim (N)
    num_ones = 4
    batch = 8

    key = jax.random.PRNGKey(0)
    k_w, k_x = jax.random.split(key)

    weight = init_embedding_weight(k_w, num_indices, embedding_dims, num_ones)
    x = jax.random.normal(k_x, (batch, num_indices), dtype=jnp.float32)

    out = jax.block_until_ready(embedding_forward(x, weight))

    # Cross-check against plain-JAX reference of F.linear(x, W) = x @ W.T.
    ref = x @ weight.T
    assert out.shape == (batch, embedding_dims)
    assert jnp.allclose(out, ref, atol=1e-5, rtol=1e-5)

    # Non-tile-aligned, multi-dim-batch path: exercises x padding along M.
    # W is NOT copied here (its dims are already 128-aligned).
    x2 = jax.random.normal(jax.random.PRNGKey(1), (2, 3, num_indices), dtype=jnp.float32)
    out2 = jax.block_until_ready(embedding_forward(x2, weight))
    ref2 = x2 @ weight.T
    assert out2.shape == (2, 3, embedding_dims)
    assert jnp.allclose(out2, ref2, atol=1e-5, rtol=1e-5)

    print("KERNEL_OK")
</pallas_src>

<mosaic_0001>
module attributes {stable_mosaic.version = 11 : i64} {
  func.func @_linear_kernel_noacc(%arg0: i32, %arg1: i32, %arg2: memref<8x256xf32, #tpu.memory_space<vmem>>, %arg3: memref<128x256xf32, #tpu.memory_space<vmem>>, %arg4: memref<8x128xf32, #tpu.memory_space<vmem>>) attributes {dimension_semantics = [#tpu.dimension_semantics<parallel>, #tpu.dimension_semantics<parallel>], iteration_bounds = array<i64: 1, 1>, scalar_prefetch = 0 : i64, scratch_operands = 0 : i64, tpu.core_type = #tpu.core_type<tc>, window_params = [{transform_indices = @transform_0, window_bounds = array<i64: 8, 256>}, {transform_indices = @transform_1, window_bounds = array<i64: 128, 256>}, {transform_indices = @transform_2, window_bounds = array<i64: 8, 128>}]} {
    %c0 = arith.constant 0 : index
    %c0_0 = arith.constant 0 : index
    %0 = vector.load %arg2[%c0, %c0_0] : memref<8x256xf32, #tpu.memory_space<vmem>>, vector<8x256xf32>
    %c0_1 = arith.constant 0 : index
    %c0_2 = arith.constant 0 : index
    %1 = vector.load %arg3[%c0_1, %c0_2] : memref<128x256xf32, #tpu.memory_space<vmem>>, vector<128x256xf32>
    %cst = arith.constant dense<0.000000e+00> : vector<8x128xf32>
    %2 = tpu.matmul %0, %1, %cst {dimension_numbers = #tpu.dot_dimension_numbers<[1], [1], [0], [0], [0, 0, 1, 0], [], []>} : vector<8x256xf32>, vector<128x256xf32>, vector<8x128xf32> -> vector<8x128xf32>
    %c0_3 = arith.constant 0 : index
    %c0_4 = arith.constant 0 : index
    %3 = vector.load %arg4[%c0_3, %c0_4] : memref<8x128xf32, #tpu.memory_space<vmem>>, vector<8x128xf32>
    tpu.vector_store %arg4[%c0_3, %c0_4], %2 {strides = array<i32>} : memref<8x128xf32, #tpu.memory_space<vmem>>, vector<8x128xf32>,
    return
  }
  func.func @transform_0(%arg0: i32, %arg1: i32) -> (i32, i32) {
    %c0_i32 = arith.constant 0 : i32
    %c0_i32_0 = arith.constant 0 : i32
    return %arg0, %c0_i32 : i32, i32
  }
  func.func @transform_1(%arg0: i32, %arg1: i32) -> (i32, i32) {
    %c0_i32 = arith.constant 0 : i32
    %c0_i32_0 = arith.constant 0 : i32
    return %arg1, %c0_i32 : i32, i32
  }
  func.func @transform_2(%arg0: i32, %arg1: i32) -> (i32, i32) {
    %c0_i32 = arith.constant 0 : i32
    return %arg0, %arg1 : i32, i32
  }
}

</mosaic_0001>

<bundles_post_ra>
// kernel: embedding_forward.1
= control target key start
LH: loop header
LB: loop body
LE: loop exit
PB: predicated region body
PF: predicated region fallthrough
CT: control target
= control target key end

     0   :  { %7 = vsyncpa [#allocation3], 0  ;;  %s259_s0 = inlined_call_operand.hbm [shape: f32[8,256], index: 0, kind: input, shape index: {}]   ;;  %s260_s1 = inlined_call_operand.hbm [shape: f32[128,256], index: 1, kind: input, shape index: {}]   ;;  %s261_s2 = inlined_call_operand.hbm [shape: f32[8,128], index: 2, kind: output, shape index: {}]  }
   0x1   :  { %8 = vsyncpa [#allocation6], 0 }
   0x2   :  { %9 = vsyncpa [#allocation4], 0  ;;  %s230_s9 = smov [#allocation2]   ;;  %s231_s11 = smov [#allocation5]  }
   0x3   :  { %s16_s10 = sshll.u32 %s230_s9, 4  ;;  %s25_s12 = sshll.u32 %s231_s11, 4  ;;  %s17_s10 = int_to_ptr.vmem [resolvable:$true] %s16_s10  ;;  %s26_s12 = int_to_ptr.vmem [resolvable:$true] %s25_s12 }
   0x4   :  { %s172_s13 = scalar_lea.vmem %s17_s10, 256  ;;  %p177_p1 = scmp.lt.s32.totalorder %s17_s10, %s17_s10 }
   0x5   :  { %p173_p0 = scmp.ne.s32.totalorder %s17_s10, %s172_s13  ;;  %p178_p2 = scmp.lt.s32.totalorder %s172_s13, %s172_s13 }
   0x7   :  { %p179_p3 = por %p178_p2, %p177_p1 }
   0x9   :  { %p180_p4 = pnand %p179_p3, %p173_p0 }
   0xb   :  { %183 = shalt.err (!%p180_p4)
}
   0xc   :  { %19 = dma.hbm_to_vmem [thread:$0]  %s259_s0, 256, %s17_s10, [#allocation3]  }
   0xd   :  { %s192_s16 = scalar_lea.vmem %s26_s12, 4096  ;;  %p197_p6 = scmp.lt.s32.totalorder %s26_s12, %s26_s12 }
   0xe   :  { %p193_p5 = scmp.ne.s32.totalorder %s26_s12, %s192_s16  ;;  %p198_p7 = scmp.lt.s32.totalorder %s192_s16, %s192_s16 }
  0x10   :  { %p199_p8 = por %p198_p7, %p197_p6 }
  0x12   :  { %p200_p9 = pnand %p199_p8, %p193_p5 }
  0x14   :  { %203 = shalt.err (!%p200_p9)
}
  0x15   :  { %s232_s17 = smov 256   ;;  %s233_s18 = smov 16  }
  0x16   :  { %31 = dma.hbm_to_vmem [thread:$0]  %s260_s1, 4096, %s26_s12, [#allocation6], %s232_s17, %s232_s17, %s233_s18  }
  0x17   :  { %224 = dma.done.wait [#allocation3], 256  }
  0x18   :  { %225 = vsyncadd [#allocation3], 4294967040 }
  0x19   :  { %226 = dma.done.wait [#allocation6], 4096  }
  0x1a   :  { %227 = vsyncadd [#allocation6], 4294963200  ;;  %v71_v0 = vld [vmem:[#allocation5 + $0xf8] sm:$0xff]  ;;  %v70_v1 = vld [vmem:[#allocation5 + $0xf0] sm:$0xff]  ;;  %s234_s0 = smov [#allocation7]  }
  0x1b   :  { %v69_v2 = vld [vmem:[#allocation5 + $0xe8] sm:$0xff]  ;;  %72 = vmatprep.subr.mxu0 %v71_v0  ;;  %v68_v3 = vld [vmem:[#allocation5 + $0xe0] sm:$0xff]  ;;  %v67_v4 = vld [vmem:[#allocation5 + $0xd8] sm:$0xff]  ;;  %s149_s1 = sshll.u32 %s234_s0, 4  ;;  %s150_s1 = int_to_ptr.vmem [resolvable:$true] %s149_s1 }
  0x1c   :  { %73 = vmatpush1.xpose.msra.mxu0 %v70_v1  ;;  %v66_v5 = vld [vmem:[#allocation5 + $0xd0] sm:$0xff]  ;;  %v65_v6 = vld [vmem:[#allocation5 + $0xc8] sm:$0xff]  ;;  %v39_v7 = vld [vmem:[#allocation2 + $0x8] sm:$0xff]  ;;  %s204_s21 = scalar_lea.vmem %s150_s1, 128  ;;  %p209_p11 = scmp.lt.s32.totalorder %s150_s1, %s150_s1 }
  0x1d   :  { %74 = vmatprep.subr.mxu0 %v69_v2  ;;  %v64_v8 = vld [vmem:[#allocation5 + $0xc0] sm:$0xff]  ;;  %136 = vmatprep.mubr.f32.mxu0 %v39_v7  ;;  %v63_v9 = vld [vmem:[#allocation5 + $0xb8] sm:$0xff]  ;;  %v62_v10 = vld [vmem:[#allocation5 + $0xb0] sm:$0xff]  ;;  %p205_p10 = scmp.ne.s32.totalorder %s150_s1, %s204_s21  ;;  %p210_p12 = scmp.lt.s32.totalorder %s204_s21, %s204_s21 }
  0x1e   :  { %v61_v11 = vld [vmem:[#allocation5 + $0xa8] sm:$0xff]  ;;  %v60_v12 = vld [vmem:[#allocation5 + $0xa0] sm:$0xff]  ;;  %v59_v13 = vld [vmem:[#allocation5 + $0x98] sm:$0xff] }
  0x1f   :  { %v58_v14 = vld [vmem:[#allocation5 + $0x90] sm:$0xff]  ;;  %v57_v15 = vld [vmem:[#allocation5 + $0x88] sm:$0xff]  ;;  %v56_v16 = vld [vmem:[#allocation5 + $0x80] sm:$0xff]  ;;  %p211_p13 = por %p210_p12, %p209_p11 }
  0x20   :  { %75 = vmatpush1.xpose.msra.mxu0 %v68_v3  ;;  %v55_v17 = vld [vmem:[#allocation5 + $0x78] sm:$0xff]  ;;  %v54_v18 = vld [vmem:[#allocation5 + $0x70] sm:$0xff]  ;;  %v53_v19 = vld [vmem:[#allocation5 + $0x68] sm:$0xff] }
  0x21   :  { %76 = vmatprep.subr.mxu0 %v67_v4  ;;  %v52_v20 = vld [vmem:[#allocation5 + $0x60] sm:$0xff]  ;;  %v51_v21 = vld [vmem:[#allocation5 + $0x58] sm:$0xff]  ;;  %v50_v22 = vld [vmem:[#allocation5 + $0x50] sm:$0xff]  ;;  %p212_p0 = pnand %p211_p13, %p205_p10 }
  0x22   :  { %v49_v23 = vld [vmem:[#allocation5 + $0x48] sm:$0xff]  ;;  %v48_v24 = vld [vmem:[#allocation5 + $0x40] sm:$0xff]  ;;  %v47_v25 = vld [vmem:[#allocation5 + $0x38] sm:$0xff] }
  0x23   :  { %v46_v26 = vld [vmem:[#allocation5 + $0x30] sm:$0xff]  ;;  %v45_v27 = vld [vmem:[#allocation5 + $0x28] sm:$0xff]  ;;  %v44_v28 = vld [vmem:[#allocation5 + $0x20] sm:$0xff] }
  0x24   :  { %77 = vmatpush1.xpose.msra.mxu0 %v66_v5  ;;  %v43_v29 = vld [vmem:[#allocation5 + $0x18] sm:$0xff]  ;;  %v42_v30 = vld [vmem:[#allocation5 + $0x10] sm:$0xff]  ;;  %v41_v31 = vld [vmem:[#allocation5 + $0x8] sm:$0xff] }
  0x25   :  { %78 = vmatprep.subr.mxu0 %v65_v6  ;;  %v40_v32 = vld [vmem:[#allocation5] sm:$0xff]  ;;  %v38_v33 = vld [vmem:[#allocation2] sm:$0xff] }
  0x28   :  { %79 = vmatpush1.xpose.msra.mxu0 %v64_v8 }
  0x29   :  { %80 = vmatprep.subr.mxu0 %v63_v9 }
  0x2c   :  { %81 = vmatpush1.xpose.msra.mxu0 %v62_v10 }
  0x2d   :  { %82 = vmatprep.subr.mxu0 %v61_v11 }
  0x30   :  { %83 = vmatpush1.xpose.msra.mxu0 %v60_v12 }
  0x31   :  { %84 = vmatprep.subr.mxu0 %v59_v13 }
  0x34   :  { %85 = vmatpush1.xpose.msra.mxu0 %v58_v14 }
  0x35   :  { %86 = vmatprep.subr.mxu0 %v57_v15 }
  0x38   :  { %87 = vmatpush1.xpose.msra.mxu0 %v56_v16 }
  0x39   :  { %88 = vmatprep.subr.mxu0 %v55_v17 }
  0x3c   :  { %89 = vmatpush1.xpose.msra.mxu0 %v54_v18 }
  0x3d   :  { %90 = vmatprep.subr.mxu0 %v53_v19 }
  0x40   :  { %91 = vmatpush1.xpose.msra.mxu0 %v52_v20 }
  0x41   :  { %92 = vmatprep.subr.mxu0 %v51_v21 }
  0x44   :  { %93 = vmatpush1.xpose.msra.mxu0 %v50_v22 }
  0x45   :  { %94 = vmatprep.subr.mxu0 %v49_v23 }
  0x48   :  { %95 = vmatpush1.xpose.msra.mxu0 %v48_v24 }
  0x49   :  { %96 = vmatprep.subr.mxu0 %v47_v25 }
  0x4c   :  { %97 = vmatpush1.xpose.msra.mxu0 %v46_v26 }
  0x4d   :  { %98 = vmatprep.subr.mxu0 %v45_v27 }
  0x50   :  { %99 = vmatpush1.xpose.msra.mxu0 %v44_v28 }
  0x51   :  { %100 = vmatprep.subr.mxu0 %v43_v29 }
  0x54   :  { %101 = vmatpush1.xpose.msra.mxu0 %v42_v30 }
  0x55   :  { %102 = vmatprep.subr.mxu0 %v41_v31 }
  0x58   :  { %103 = vmatpush1.xpose.msra.mxu0 %v40_v32 }
  0x5b   :  { %137 = vmatmul.mubr.f32.vlgmr.msra.gmra.mxu0 %v38_v33 }
 0x11b   :  { %v138_v34 = vpop.f32.mrf.mxu0 }
 0x11c   :  { %142 = vst [vmem:[#allocation7] sm:$0xff] %v138_v34 }
 0x11d   :  { %v140_v35 = vpop.f32.mrf.mxu0 }
 0x11e   :  { %215 = shalt.err (!%p212_p0)
}
 0x11f   :  { %152 = dma.vmem_to_hbm [thread:$0]  %s150_s1, 128, %s261_s2, [#allocation4]  }
 0x120   :  { %228 = dma.done.wait [#allocation4], 128  }
 0x121   :  { %229 = vsyncadd [#allocation4], 4294967168 }
 0x122   :  { %156 = vsyncpa [#allocation3], 1 }
 0x123   :  { %157 = vsyncpa [#allocation6], 1 }
 0x124   :  { %158 = vsyncpa [#allocation4], 1 }

</bundles_post_ra>
